<compile_context>
chip_gen: v5e
topology: v5e:2x2
jax: 0.10.0
libtpu: 0.0.40
codegen_flags: <defaults>
</compile_context>

<pallas_src>
import jax
import jax.numpy as jnp
from jax.experimental import pallas as pl
from jax.experimental.pallas import tpu as pltpu


def _round_up(n: int, m: int) -> int:
    return ((n + m - 1) // m) * m


def _vmem_capacity_bytes() -> int:
    try:
        return int(pltpu.get_tpu_info().vmem_capacity_bytes)
    except Exception:
        return 64 << 20  # conservative fallback (v7x per-TensorCore VMEM)


def _pick_th(hdim: int, target: int) -> int:
    """Largest 128-multiple divisor of hdim that is <= target."""
    if hdim <= target:
        return hdim
    start = max(128, target - target % 128)
    for cand in range(start, 0, -128):
        if hdim % cand == 0:
            return cand
    return hdim  # pathological hdim: fall back to a single chunk


def _mlp_kernel(x_ref, w_fc_ref, w_proj_ref, o_ref, acc_ref):
    # x_ref:      (tm, dim)   bf16
    # w_fc_ref:   (dim, th)   bf16  -- chunk of c_fc.weight.T
    # w_proj_ref: (th, dim)   bf16  -- chunk of c_proj.weight.T
    # o_ref:      (tm, dim)
    # acc_ref:    (tm, dim) f32 VMEM scratch (persists across the hdim axis)
    h = pl.program_id(1)

    @pl.when(h == 0)
    def _():
        acc_ref[...] = jnp.zeros_like(acc_ref)

    a = jnp.dot(x_ref[...], w_fc_ref[...], preferred_element_type=jnp.float32)
    a = jnp.maximum(a, 0.0)
    a = a * a  # relu(.)^2, fused per hdim chunk
    acc_ref[...] += jnp.dot(a.astype(w_proj_ref.dtype), w_proj_ref[...],
                            preferred_element_type=jnp.float32)

    @pl.when(h == pl.num_programs(1) - 1)
    def _():
        o_ref[...] = acc_ref[...].astype(o_ref.dtype)


def mlp_forward(x, w_fc_t, w_proj_t, *, tm=None, th=None,
                compute_dtype=jnp.bfloat16, out_dtype=None):
    """Fused MLP forward.

    x:        (..., dim)
    w_fc_t:   (dim, hdim)   == c_fc.weight.T   (pre-transposed, ideally bf16)
    w_proj_t: (hdim, dim)   == c_proj.weight.T (pre-transposed, ideally bf16)
    """
    *lead, dim = x.shape
    hdim = w_fc_t.shape[1]
    assert w_fc_t.shape == (dim, hdim)
    assert w_proj_t.shape == (hdim, dim)

    out_dtype = compute_dtype if out_dtype is None else out_dtype
    cbytes = jnp.dtype(compute_dtype).itemsize
    obytes = jnp.dtype(out_dtype).itemsize

    # Weights should already live in the compute dtype (init_mlp_params does
    # this); the casts below are no-ops in that case (no extra HBM pass).
    wf = w_fc_t if w_fc_t.dtype == compute_dtype else w_fc_t.astype(compute_dtype)
    wp = w_proj_t if w_proj_t.dtype == compute_dtype else w_proj_t.astype(compute_dtype)

    # Cast activations BEFORE padding: pad copy moves half the bytes.
    x2d = x.reshape(-1, dim).astype(compute_dtype)
    M = x2d.shape[0]

    # ---- generation-aware tile plan -------------------------------------
    vmem_cap = _vmem_capacity_bytes()
    small_vmem = vmem_cap <= (96 << 20)          # v7x-like: 64 MiB / TensorCore
    budget = int(vmem_cap * 0.85)

    tm_target = tm if tm is not None else (512 if small_vmem else 768)
    th_target = th if th is not None else (512 if small_vmem else 1024)

    row_align = 16 if cbytes == 2 else 8
    th_eff = _pick_th(hdim, th_target)

    tm_eff = tm_target
    if small_vmem and M > 256:
        # keep >= 2 token tiles so both v7x TensorCores get work
        tm_eff = min(tm_eff, max(256, _round_up(-(-M // 2), 256)))
    tm_eff = max(row_align, min(tm_eff, _round_up(M, row_align)))

    grid_h0 = hdim // th_eff
    # Single-buffer the h-invariant x/out tiles only on tight-VMEM parts and
    # only when they are actually amortized over >= 2 h steps.
    use_single_buf = small_vmem and grid_h0 >= 2
    xbuf = 1 if use_single_buf else 2
    obuf = 1 if use_single_buf else 2

    def vmem_need(tm_e, th_e):
        return (xbuf * tm_e * dim * cbytes            # x tiles
                + 2 * dim * th_e * cbytes             # W_fc^T chunks (dbl-buf)
                + 2 * th_e * dim * cbytes             # W_proj^T chunks (dbl-buf)
                + obuf * tm_e * dim * obytes          # out tiles
                + tm_e * dim * 4                      # f32 accumulator
                + tm_e * th_e * (4 + cbytes))         # relu^2 intermediates

    # Shrink the plan until it fits the per-core VMEM budget.
    while vmem_need(tm_eff, th_eff) > budget:
        if tm_eff > 256:
            tm_eff = max(256, tm_eff // 2)
        elif th_eff > 128 and th_eff % 256 == 0:
            th_eff //= 2                               # still divides hdim, 128-aligned
        elif tm_eff > row_align:
            tm_eff = max(row_align, tm_eff // 2)
        else:
            break

    m_pad = _round_up(M, tm_eff)
    if m_pad != M:
        x2d = jnp.pad(x2d, ((0, m_pad - M), (0, 0)))

    grid_h = hdim // th_eff
    grid = (m_pad // tm_eff, grid_h)

    x_kwargs = dict(pipeline_mode=pl.Buffered(1)) if use_single_buf else {}
    o_kwargs = dict(pipeline_mode=pl.Buffered(1)) if use_single_buf else {}

    in_specs = [
        pl.BlockSpec((tm_eff, dim), lambda i, h: (i, 0), **x_kwargs),   # x tile
        pl.BlockSpec((dim, th_eff), lambda i, h: (0, h)),               # W_fc^T chunk
        pl.BlockSpec((th_eff, dim), lambda i, h: (h, 0)),               # W_proj^T chunk
    ]
    out_specs = pl.BlockSpec((tm_eff, dim), lambda i, h: (i, 0), **o_kwargs)

    need = vmem_need(tm_eff, th_eff)
    vmem_limit = max(32 << 20, min(int(need * 1.25) + (4 << 20),
                                   int(vmem_cap * 0.9)))

    n_token_tiles = m_pad // tm_eff
    cost = pl.CostEstimate(
        flops=4 * m_pad * dim * hdim,  # two matmuls, 2*M*dim*hdim each
        transcendentals=0,
        bytes_accessed=(x2d.size * cbytes
                        + n_token_tiles * (wf.size + wp.size) * cbytes
                        + m_pad * dim * obytes),
    )

    out2d = pl.pallas_call(
        _mlp_kernel,
        out_shape=jax.ShapeDtypeStruct((m_pad, dim), out_dtype),
        grid_spec=pltpu.PrefetchScalarGridSpec(
            num_scalar_prefetch=0,
            grid=grid,
            in_specs=in_specs,
            out_specs=out_specs,
            scratch_shapes=[pltpu.VMEM((tm_eff, dim), jnp.float32)],
        ),
        compiler_params=pltpu.CompilerParams(
            dimension_semantics=("parallel", "arbitrary"),
            vmem_limit_bytes=vmem_limit,
        ),
        cost_estimate=cost,
    )(x2d, wf, wp)

    return out2d[:M].reshape(*lead, dim)


def init_mlp_params(key, dim, *, param_dtype=jnp.bfloat16):
    """Matches MLP.__init__ / CastedLinear.reset_parameters from train_gpt.py.
    Weights are returned pre-transposed to [in, out] layout and pre-cast to the
    MXU compute dtype, so no per-call transpose/cast happens in the wrapper."""
    hdim = 4 * dim
    std = 0.5 * dim ** (-0.5)
    bound = (3.0 ** 0.5) * std
    w_fc = jax.random.uniform(key, (hdim, dim), jnp.float32,
                              minval=-bound, maxval=bound)   # torch layout (out, in)
    w_proj = jnp.zeros((dim, hdim), jnp.float32)             # zero-initialized
    return w_fc.T.astype(param_dtype), w_proj.T.astype(param_dtype)


def mlp_reference(x, w_fc_t, w_proj_t, compute_dtype=jnp.bfloat16, out_dtype=None):
    # Same bf16-compute / f32-accumulate numerics as the kernel.
    out_dtype = compute_dtype if out_dtype is None else out_dtype
    xc = x.astype(compute_dtype)
    h = jnp.dot(xc, w_fc_t.astype(compute_dtype),
                preferred_element_type=jnp.float32)
    h = jnp.square(jnp.maximum(h, 0.0))
    y = jnp.dot(h.astype(compute_dtype), w_proj_t.astype(compute_dtype),
                preferred_element_type=jnp.float32)
    return y.astype(out_dtype)


if __name__ == "__main__":
    key = jax.random.PRNGKey(0)
    batch, seq, dim = 2, 8, 32
    hdim = 4 * dim

    k_x, k_fc, k_proj = jax.random.split(key, 3)

    # Module-faithful init (c_proj zero-initialized), pre-transposed + bf16.
    w_fc_t, w_proj_t = init_mlp_params(k_fc, dim)
    x = jax.random.normal(k_x, (batch, seq, dim), jnp.float32)

    out = jax.block_until_ready(mlp_forward(x, w_fc_t, w_proj_t))
    ref = mlp_reference(x, w_fc_t, w_proj_t)
    assert out.shape == (batch, seq, dim)
    assert jnp.allclose(out.astype(jnp.float32), ref.astype(jnp.float32),
                        atol=1e-2, rtol=1e-2)

    # Also exercise the projection path with a non-zero c_proj weight.
    std_p = 0.5 * hdim ** (-0.5)
    bound_p = (3.0 ** 0.5) * std_p
    w_proj_rand_t = jax.random.uniform(k_proj, (dim, hdim), jnp.float32,
                                       minval=-bound_p, maxval=bound_p
                                       ).T.astype(jnp.bfloat16)
    out2 = jax.block_until_ready(mlp_forward(x, w_fc_t, w_proj_rand_t))
    ref2 = mlp_reference(x, w_fc_t, w_proj_rand_t)
    assert jnp.allclose(out2.astype(jnp.float32), ref2.astype(jnp.float32),
                        atol=1e-2, rtol=1e-2)

    print("KERNEL_OK")
</pallas_src>

<mosaic_0001>
module attributes {stable_mosaic.version = 11 : i64} {
  func.func @_mlp_kernel(%arg0: i32, %arg1: i32, %arg2: memref<16x32xbf16, #tpu.memory_space<vmem>>, %arg3: memref<32x128xbf16, #tpu.memory_space<vmem>>, %arg4: memref<128x32xbf16, #tpu.memory_space<vmem>>, %arg5: memref<16x32xbf16, #tpu.memory_space<vmem>>, %arg6: memref<16x32xf32, #tpu.memory_space<vmem>>) attributes {dimension_semantics = [#tpu.dimension_semantics<parallel>, #tpu.dimension_semantics<arbitrary>], iteration_bounds = array<i64: 1, 1>, scalar_prefetch = 0 : i64, scratch_operands = 1 : i64, tpu.core_type = #tpu.core_type<tc>, window_params = [{transform_indices = @transform_0, window_bounds = array<i64: 16, 32>}, {transform_indices = @transform_1, window_bounds = array<i64: 32, 128>}, {transform_indices = @transform_2, window_bounds = array<i64: 128, 32>}, {transform_indices = @transform_3, window_bounds = array<i64: 16, 32>}]} {
    %c0_i32 = arith.constant 0 : i32
    %0 = arith.cmpi eq, %arg1, %c0_i32 : i32
    %1 = arith.extui %0 : i1 to i32
    %c0_i32_0 = arith.constant 0 : i32
    %2 = arith.cmpi ne, %1, %c0_i32_0 : i32
    scf.if %2 {
      %cst_14 = arith.constant 0.000000e+00 : f32
      %18 = vector.broadcast %cst_14 : f32 to vector<16x32xf32>
      %c0_15 = arith.constant 0 : index
      %c0_16 = arith.constant 0 : index
      %19 = vector.load %arg6[%c0_15, %c0_16] : memref<16x32xf32, #tpu.memory_space<vmem>>, vector<16x32xf32>
      tpu.vector_store %arg6[%c0_15, %c0_16], %18 {strides = array<i32>} : memref<16x32xf32, #tpu.memory_space<vmem>>, vector<16x32xf32>,
    } else {
    }
    %c0 = arith.constant 0 : index
    %c0_1 = arith.constant 0 : index
    %3 = vector.load %arg2[%c0, %c0_1] : memref<16x32xbf16, #tpu.memory_space<vmem>>, vector<16x32xbf16>
    %c0_2 = arith.constant 0 : index
    %c0_3 = arith.constant 0 : index
    %4 = vector.load %arg3[%c0_2, %c0_3] : memref<32x128xbf16, #tpu.memory_space<vmem>>, vector<32x128xbf16>
    %cst = arith.constant dense<0.000000e+00> : vector<16x128xf32>
    %5 = tpu.matmul %3, %4, %cst {dimension_numbers = #tpu.dot_dimension_numbers<[1], [0], [0], [1], [0, 0, 1, 1], [], []>} : vector<16x32xbf16>, vector<32x128xbf16>, vector<16x128xf32> -> vector<16x128xf32>
    %cst_4 = arith.constant 0.000000e+00 : f32
    %6 = vector.broadcast %cst_4 : f32 to vector<16x128xf32>
    %7 = arith.maximumf %5, %6 : vector<16x128xf32>
    %8 = arith.mulf %7, %7 : vector<16x128xf32>
    %c0_5 = arith.constant 0 : index
    %c0_6 = arith.constant 0 : index
    %9 = vector.load %arg6[%c0_5, %c0_6] : memref<16x32xf32, #tpu.memory_space<vmem>>, vector<16x32xf32>
    %10 = arith.truncf %8 : vector<16x128xf32> to vector<16x128xbf16>
    %c0_7 = arith.constant 0 : index
    %c0_8 = arith.constant 0 : index
    %11 = vector.load %arg4[%c0_7, %c0_8] : memref<128x32xbf16, #tpu.memory_space<vmem>>, vector<128x32xbf16>
    %cst_9 = arith.constant dense<0.000000e+00> : vector<16x32xf32>
    %12 = tpu.matmul %10, %11, %cst_9 {dimension_numbers = #tpu.dot_dimension_numbers<[1], [0], [0], [1], [0, 0, 1, 1], [], []>} : vector<16x128xbf16>, vector<128x32xbf16>, vector<16x32xf32> -> vector<16x32xf32>
    %13 = arith.addf %9, %12 : vector<16x32xf32>
    %c0_10 = arith.constant 0 : index
    %c0_11 = arith.constant 0 : index
    %14 = vector.load %arg6[%c0_10, %c0_11] : memref<16x32xf32, #tpu.memory_space<vmem>>, vector<16x32xf32>
    tpu.vector_store %arg6[%c0_10, %c0_11], %13 {strides = array<i32>} : memref<16x32xf32, #tpu.memory_space<vmem>>, vector<16x32xf32>,
    %c0_i32_12 = arith.constant 0 : i32
    %15 = arith.cmpi eq, %arg1, %c0_i32_12 : i32
    %16 = arith.extui %15 : i1 to i32
    %c0_i32_13 = arith.constant 0 : i32
    %17 = arith.cmpi ne, %16, %c0_i32_13 : i32
    scf.if %17 {
      %c0_14 = arith.constant 0 : index
      %c0_15 = arith.constant 0 : index
      %18 = vector.load %arg6[%c0_14, %c0_15] : memref<16x32xf32, #tpu.memory_space<vmem>>, vector<16x32xf32>
      %19 = arith.truncf %18 : vector<16x32xf32> to vector<16x32xbf16>
      %c0_16 = arith.constant 0 : index
      %c0_17 = arith.constant 0 : index
      %20 = vector.load %arg5[%c0_16, %c0_17] : memref<16x32xbf16, #tpu.memory_space<vmem>>, vector<16x32xbf16>
      tpu.vector_store %arg5[%c0_16, %c0_17], %19 {strides = array<i32>} : memref<16x32xbf16, #tpu.memory_space<vmem>>, vector<16x32xbf16>,
    } else {
    }
    return
  }
  func.func @transform_0(%arg0: i32, %arg1: i32) -> (i32, i32) {
    %c0_i32 = arith.constant 0 : i32
    %c0_i32_0 = arith.constant 0 : i32
    return %arg0, %c0_i32 : i32, i32
  }
  func.func @transform_1(%arg0: i32, %arg1: i32) -> (i32, i32) {
    %c0_i32 = arith.constant 0 : i32
    %c0_i32_0 = arith.constant 0 : i32
    return %c0_i32, %arg1 : i32, i32
  }
  func.func @transform_2(%arg0: i32, %arg1: i32) -> (i32, i32) {
    %c0_i32 = arith.constant 0 : i32
    %c0_i32_0 = arith.constant 0 : i32
    return %arg1, %c0_i32 : i32, i32
  }
  func.func @transform_3(%arg0: i32, %arg1: i32) -> (i32, i32) {
    %c0_i32 = arith.constant 0 : i32
    %c0_i32_0 = arith.constant 0 : i32
    return %arg0, %c0_i32 : i32, i32
  }
}

</mosaic_0001>

<bundles_post_ra>
// kernel: tpu_custom_call.1
= control target key start
LH: loop header
LB: loop body
LE: loop exit
PB: predicated region body
PF: predicated region fallthrough
CT: control target
= control target key end

     0   :  { %s332_s0 = inlined_call_operand.vmem [shape: bf16[16,32], index: 0, kind: input, shape index: {}]   ;;  %s333_s1 = inlined_call_operand.vmem [shape: bf16[32,128], index: 1, kind: input, shape index: {}]   ;;  %s334_s2 = inlined_call_operand.vmem [shape: bf16[128,32], index: 2, kind: input, shape index: {}]   ;;  %s335_s3 = inlined_call_operand.hbm [shape: bf16[16,32], index: 3, kind: output, shape index: {}]  }
   0x1   :  { %v228_v0 = vld [vmem:[%s333_s1 + $0x8] sm:$0xff]  ;;  %v236_v1 = vld [vmem:[%s334_s2 + $0x38] sm:$0xff]  ;;  %v227_v2 = vld [vmem:[%s333_s1] sm:$0xff] }
   0x2   :  { %56 = vmatpush.bf16.msra.mxu0 %v228_v0 }
   0x3   :  { %8 = vsyncpa [#allocation4], 0  ;;  %135 = vmatpush.bf16.msra.mxu1 %v236_v1  ;;  %v235_v3 = vld [vmem:[%s334_s2 + $0x30] sm:$0xff]  ;;  %v226_v4 = vld [vmem:[%s332_s0] sm:$0xff]  ;;  %vm20_vm0 = vcmask 261120   ;;  %v267_v11 = vmov 0.0  }
   0x4   :  { %v234_v5 = vld [vmem:[%s334_s2 + $0x28] sm:$0xff]  ;;  %v233_v6 = vld [vmem:[%s334_s2 + $0x20] sm:$0xff]  ;;  %v232_v7 = vld [vmem:[%s334_s2 + $0x18] sm:$0xff]  ;;  %21 = vst.msk [vmem:[#allocation2] sm:$0xff] %vm20_vm0, %v267_v11  ;;  %vm160_vm1 = vcmask 257024   ;;  %s169_s8 = sshll.u32 %s335_s3, 4  ;;  %s170_s8 = int_to_ptr.hbm [resolvable:$true] %s169_s8 }
   0x5   :  { %v231_v8 = vld [vmem:[%s334_s2 + $0x10] sm:$0xff]  ;;  %v230_v9 = vld [vmem:[%s334_s2 + $0x8] sm:$0xff]  ;;  %v229_v10 = vld [vmem:[%s334_s2] sm:$0xff]  ;;  %22 = vst.msk [vmem:[#allocation2 + $0x8] sm:$0xff] %vm20_vm0, %v267_v11  ;;  %s268_s2 = smov [#allocation3]   ;;  %s269_s9 = smov 64  }
   0x6   :  { %57 = vmatpush.bf16.msra.mxu0 %v227_v2  ;;  %s167_s5 = sshll.u32 %s268_s2, 4  ;;  %s270_s10 = smov 4   ;;  %s168_s5 = int_to_ptr.vmem [resolvable:$true] %s167_s5 }
   0x7   :  { %136 = vmatpush.bf16.msra.mxu1 %v235_v3 }
   0x9   :  { %193 = vmatmul.msk.bf16.vlgmr.msra.gmra.mxu0 %vm20_vm0, %v226_v4 }
   0xb   :  { %137 = vmatpush.bf16.msra.mxu1 %v234_v5  ;;  %v68_v19 = vld [vmem:[#allocation2] sm:$0xff] }
   0xc   :  { %v69_v22 = vld [vmem:[#allocation2 + $0x8] sm:$0xff] }
   0xf   :  { %138 = vmatpush.bf16.msra.mxu1 %v233_v6 }
  0x13   :  { %139 = vmatpush.bf16.msra.mxu1 %v232_v7 }
  0x17   :  { %140 = vmatpush.bf16.msra.mxu1 %v231_v8 }
  0x1b   :  { %141 = vmatpush.bf16.msra.mxu1 %v230_v9 }
  0x1f   :  { %142 = vmatpush.bf16.msra.mxu1 %v229_v10 }
  0x86   :  { %v59_v12 = vpop.f32.mrf.mxu0 }
  0x87   :  { %v64_v13 = vmax.f32 %v59_v12, 0.0 }
  0x89   :  { %v66_v16 = vmul.f32 %v64_v13, %v64_v13 }
  0x8e   :  { %v61_v14 = vpop.f32.mrf.mxu0 }
  0x8f   :  { %v65_v15 = vmax.f32 %v61_v14, 0.0 }
  0x91   :  { %v67_v17 = vmul.f32 %v65_v15, %v65_v15 }
  0x93   :  { %v70_v18 = vpack.c.bf16 %v67_v17, %v66_v16 }
  0x95   :  { %143 = vmatmul.bf16.vlgmr.msra.gmra.mxu1 %v70_v18 }
 0x112   :  { %v144_v20 = vpop.f32.mrf.mxu1 }
 0x113   :  { %v149_v21 = vadd.f32 %v144_v20, %v68_v19 }
 0x115   :  { %151 = vst.msk [vmem:[#allocation2] sm:$0xff] %vm20_vm0, %v149_v21 }
 0x11a   :  { %v146_v23 = vpop.f32.mrf.mxu1 }
 0x11b   :  { %v150_v24 = vadd.f32 %v146_v23, %v69_v22 }
 0x11c   :  { %v156_v25 = vld [vmem:[#allocation2] sm:$0xff] }
 0x11d   :  { %152 = vst.msk [vmem:[#allocation2 + $0x8] sm:$0xff] %vm20_vm0, %v150_v24  ;;  %v158_v26 = vpack.c.bf16 %v156_v25, %v156_v25 }
 0x11f   :  { %161 = vst.msk [vmem:[#allocation3] sm:$0xf] %vm160_vm1, %v158_v26 }
 0x124   :  { %v157_v27 = vld [vmem:[#allocation2 + $0x8] sm:$0xff] }
 0x125   :  { %v159_v28 = vpack.c.bf16 %v157_v27, %v157_v27 }
 0x127   :  { %162 = vst.msk [vmem:[#allocation3 + $0x4] sm:$0xf] %vm160_vm1, %v159_v28 }
 0x128   :  { %175 = dma.vmem_to_hbm [thread:$0]  %s168_s5, 128, %s170_s8, [#allocation4], %s269_s9, %s269_s9, %s270_s10  }
 0x129   :  { %265 = dma.done.wait [#allocation4], 128  }
 0x12a   :  { %266 = vsyncadd [#allocation4], 4294967168 }
 0x12b   :  { %180 = vsyncpa [#allocation4], 1 }

</bundles_post_ra>
